<compile_context>
chip_gen: v7x
topology: tpu7x:2x2x1
jax: 0.10.0
libtpu: 0.0.40
codegen_flags: <defaults>
</compile_context>

<pallas_src>
import jax
import jax.numpy as jnp
from jax import lax
from jax.experimental import pallas as pl
from jax.experimental.pallas import tpu as pltpu

H = 64  # LSTM hidden size (fixed by the module)


def _rnn_kernel(xflat_ref, wih_f_ref, whh_f_ref, b_f_ref, wih_r_ref, b_r_ref,
                wlin_f_ref, wlin_r_ref, blin_ref, out_ref, gx_sc):
    """Whole bidirectional-LSTM + linear forward in one invocation.

    xflat_ref : (T*B, I)  seq-major input, flattened in the wrapper (layout
                plumbing only) so the x-projection is ONE big MXU matmul.
    gx_sc     : (T*B, 4H) VMEM scratch holding x @ W_ih + b for every step,
                computed off the recurrence's serial critical path.
    Gate column order (set by the wrapper): [f, i, o, g].
    """
    TB = xflat_ref.shape[0]
    B = out_ref.shape[0]
    T = TB // B

    # ---------------- off-critical-path precompute ---------------------------
    # (a) x-projection for ALL time steps in a single matmul, bias folded in,
    #     so the recurrence only carries the (B,H)@(H,4H) h-projection.
    gx_sc[...] = (
        jnp.dot(xflat_ref[...], wih_f_ref[...],
                preferred_element_type=jnp.float32)
        + jnp.broadcast_to(b_f_ref[...], (TB, 4 * H)))

    # (b) Backward direction: output[-1] only needs the FIRST backward step,
    #     taken on x[T-1] with zero initial (h, c), so the h @ W_hh_r and
    #     f*c0 terms vanish (w_hh_r is intentionally unused -- revisit if the
    #     full sequence output is ever needed). Independent of the forward
    #     recurrence, so it is issued before the loop.
    x_last = xflat_ref[pl.ds((T - 1) * B, B), :]
    gates_r = (jnp.dot(x_last, wih_r_ref[...],
                       preferred_element_type=jnp.float32) + b_r_ref[...])
    sg_r = jax.nn.sigmoid(gates_r[:, :3 * H])            # [f | i | o]
    g_r = jnp.tanh(gates_r[:, 3 * H:])
    c_r = sg_r[:, H:2 * H] * g_r                         # i*g   (f*c0 == 0)
    h_r = sg_r[:, 2 * H:3 * H] * jnp.tanh(c_r)           # o*tanh(c)
    out_partial = (jnp.dot(h_r, wlin_r_ref[...],
                           preferred_element_type=jnp.float32)
                   + blin_ref[...])

    # ---------------- forward recurrence --------------------------------------
    # h and c live in the fori_loop carry (vregs): no per-step VMEM
    # store/load on the serial dependency chain.
    def step(t, carry):
        h, c = carry
        gates = (gx_sc[pl.ds(t * B, B), :]
                 + jnp.dot(h, whh_f_ref[...],
                           preferred_element_type=jnp.float32))
        sg = jax.nn.sigmoid(gates[:, :3 * H])            # [f | i | o]
        g = jnp.tanh(gates[:, 3 * H:])                   # tanh(g)
        c = sg[:, :H] * c + sg[:, H:2 * H] * g           # f*c + i*g
        h = sg[:, 2 * H:3 * H] * jnp.tanh(c)             # o*tanh(c)
        return (h, c)

    zeros = jnp.zeros((B, H), jnp.float32)
    # T is small & static -> full unroll keeps LLO scheduler visibility.
    # TODO(synk): for long T use unroll=4..8 and chunk the gate scratch so it
    # fits v7x's 64 MiB VMEM (32 MiB scoped default) instead of full unroll.
    h_fwd, _ = lax.fori_loop(0, T, step, (zeros, zeros), unroll=True)

    # Final linear with split weights: avoids a lane-concat of (h_fwd, h_r).
    out_ref[...] = out_partial + jnp.dot(
        h_fwd, wlin_f_ref[...], preferred_element_type=jnp.float32)


def _reorder_gates(w):
    """PyTorch gate order along the last axis is [i, f, g, o]; reorder to
    [f, i, o, g]: the sigmoid span stays contiguous and f / o land at lane
    offsets 0 / 128, lane-aligned with c / h."""
    return jnp.concatenate(
        [w[..., H:2 * H], w[..., 0:H], w[..., 3 * H:4 * H], w[..., 2 * H:3 * H]],
        axis=-1)


def rnn_forward(x, p):
    """x: (T, B, I) float32 -> (B, num_classes) float32."""
    T, B, I = x.shape
    C = p["b_lin"].shape[0]

    # One-time weight glue (outside the kernel): transpose to row-major
    # matmul layout + gate-column reorder + bias fold.
    wih_f = _reorder_gates(p["w_ih_f"].T)                 # (I, 4H)
    whh_f = _reorder_gates(p["w_hh_f"].T)                 # (H, 4H)
    b_f = _reorder_gates(p["b_ih_f"] + p["b_hh_f"]).reshape(1, 4 * H)

    wih_r = _reorder_gates(p["w_ih_r"].T)                 # (I, 4H)
    b_r = _reorder_gates(p["b_ih_r"] + p["b_hh_r"]).reshape(1, 4 * H)
    # p["w_hh_r"] is intentionally unused: only the first backward step (zero
    # initial state) contributes to output[-1].

    wlin_T = p["w_lin"].T                                 # (2H, C)
    wlin_f, wlin_r = wlin_T[:H], wlin_T[H:]
    blin = p["b_lin"].reshape(1, C)

    # Layout plumbing only: flatten (T, B, I) -> (T*B, I) so the kernel does
    # the x-projection as one matmul without an in-kernel cross-tile reshape.
    x_flat = x.reshape(T * B, I)

    # No grid: x (T*B*I*4 B) and the precomputed gate slab (T*B*4H*4 B) are
    # tiny and whole-array VMEM resident; the recurrence lives in-kernel.
    return pl.pallas_call(
        _rnn_kernel,
        out_shape=jax.ShapeDtypeStruct((B, C), jnp.float32),
        scratch_shapes=[pltpu.VMEM((T * B, 4 * H), jnp.float32)],  # x-gates
    )(x_flat, wih_f, whh_f, b_f, wih_r, b_r, wlin_f, wlin_r, blin)


# ------------------------- pure-JAX reference -------------------------------
def _lstm_dir_ref(x_seq, w_ih, w_hh, b_ih, b_hh):
    def step(carry, x_t):
        h, c = carry
        gates = x_t @ w_ih.T + h @ w_hh.T + b_ih + b_hh
        i, f, g, o = jnp.split(gates, 4, axis=-1)
        i, f, o = jax.nn.sigmoid(i), jax.nn.sigmoid(f), jax.nn.sigmoid(o)
        g = jnp.tanh(g)
        c = f * c + i * g
        h = o * jnp.tanh(c)
        return (h, c), h
    B = x_seq.shape[1]
    init = (jnp.zeros((B, H), jnp.float32), jnp.zeros((B, H), jnp.float32))
    _, hs = jax.lax.scan(step, init, x_seq)
    return hs


def rnn_ref(x, p):
    h_f = _lstm_dir_ref(x, p["w_ih_f"], p["w_hh_f"], p["b_ih_f"], p["b_hh_f"])
    h_b = _lstm_dir_ref(x[::-1], p["w_ih_r"], p["w_hh_r"],
                        p["b_ih_r"], p["b_hh_r"])[::-1]
    out = jnp.concatenate([h_f, h_b], axis=-1)[-1]        # output[-1], (B, 2H)
    return out @ p["w_lin"].T + p["b_lin"]


# ----------------------------------------------------------------------------
def init_params(key, input_size, num_classes):
    k = 1.0 / jnp.sqrt(jnp.float32(H))
    names_shapes = [
        ("w_ih_f", (4 * H, input_size)), ("w_hh_f", (4 * H, H)),
        ("b_ih_f", (4 * H,)), ("b_hh_f", (4 * H,)),
        ("w_ih_r", (4 * H, input_size)), ("w_hh_r", (4 * H, H)),
        ("b_ih_r", (4 * H,)), ("b_hh_r", (4 * H,)),
        ("w_lin", (num_classes, 2 * H)), ("b_lin", (num_classes,)),
    ]
    keys = jax.random.split(key, len(names_shapes))
    return {name: jax.random.uniform(kk, shape, jnp.float32, -k, k)
            for kk, (name, shape) in zip(keys, names_shapes)}


if __name__ == "__main__":
    T, B, I, C = 8, 2, 32, 10
    key = jax.random.PRNGKey(0)
    kx, kp = jax.random.split(key)
    x = jax.random.normal(kx, (T, B, I), jnp.float32)
    params = init_params(kp, I, C)

    out = jax.block_until_ready(rnn_forward(x, params))
    ref = jax.block_until_ready(rnn_ref(x, params))
    assert out.shape == (B, C)
    assert jnp.allclose(out, ref, atol=1e-5, rtol=1e-5), (out, ref)
    print("KERNEL_OK")
</pallas_src>

<mosaic_0001>
module attributes {stable_mosaic.version = 11 : i64} {
  func.func @_rnn_kernel(%arg0: memref<16x32xf32, #tpu.memory_space<vmem>>, %arg1: memref<32x256xf32, #tpu.memory_space<vmem>>, %arg2: memref<64x256xf32, #tpu.memory_space<vmem>>, %arg3: memref<1x256xf32, #tpu.memory_space<vmem>>, %arg4: memref<32x256xf32, #tpu.memory_space<vmem>>, %arg5: memref<1x256xf32, #tpu.memory_space<vmem>>, %arg6: memref<64x10xf32, #tpu.memory_space<vmem>>, %arg7: memref<64x10xf32, #tpu.memory_space<vmem>>, %arg8: memref<1x10xf32, #tpu.memory_space<vmem>>, %arg9: memref<2x10xf32, #tpu.memory_space<vmem>>, %arg10: memref<16x256xf32, #tpu.memory_space<vmem>>) attributes {dimension_semantics = [], scalar_prefetch = 0 : i64, scratch_operands = 1 : i64, tpu.core_type = #tpu.core_type<tc>} {
    %c0 = arith.constant 0 : index
    %c0_0 = arith.constant 0 : index
    %0 = vector.load %arg0[%c0, %c0_0] : memref<16x32xf32, #tpu.memory_space<vmem>>, vector<16x32xf32>
    %c0_1 = arith.constant 0 : index
    %c0_2 = arith.constant 0 : index
    %1 = vector.load %arg1[%c0_1, %c0_2] : memref<32x256xf32, #tpu.memory_space<vmem>>, vector<32x256xf32>
    %cst = arith.constant dense<0.000000e+00> : vector<16x256xf32>
    %2 = tpu.matmul %0, %1, %cst {dimension_numbers = #tpu.dot_dimension_numbers<[1], [0], [0], [1], [0, 0, 1, 1], [], []>} : vector<16x32xf32>, vector<32x256xf32>, vector<16x256xf32> -> vector<16x256xf32>
    %c0_3 = arith.constant 0 : index
    %c0_4 = arith.constant 0 : index
    %3 = vector.load %arg3[%c0_3, %c0_4] : memref<1x256xf32, #tpu.memory_space<vmem>>, vector<1x256xf32>
    %4 = vector.shape_cast %3 : vector<1x256xf32> to vector<1x256xf32>
    %5 = vector.broadcast %4 : vector<1x256xf32> to vector<16x256xf32>
    %6 = arith.addf %2, %5 : vector<16x256xf32>
    %c0_5 = arith.constant 0 : index
    %c0_6 = arith.constant 0 : index
    %7 = vector.load %arg10[%c0_5, %c0_6] : memref<16x256xf32, #tpu.memory_space<vmem>>, vector<16x256xf32>
    tpu.vector_store %arg10[%c0_5, %c0_6], %6 {strides = array<i32>} : memref<16x256xf32, #tpu.memory_space<vmem>>, vector<16x256xf32>,
    %c14 = arith.constant 14 : index
    %c0_7 = arith.constant 0 : index
    %8 = vector.load %arg0[%c14, %c0_7] : memref<16x32xf32, #tpu.memory_space<vmem>>, vector<2x32xf32>
    %c0_8 = arith.constant 0 : index
    %c0_9 = arith.constant 0 : index
    %9 = vector.load %arg4[%c0_8, %c0_9] : memref<32x256xf32, #tpu.memory_space<vmem>>, vector<32x256xf32>
    %cst_10 = arith.constant dense<0.000000e+00> : vector<2x256xf32>
    %10 = tpu.matmul %8, %9, %cst_10 {dimension_numbers = #tpu.dot_dimension_numbers<[1], [0], [0], [1], [0, 0, 1, 1], [], []>} : vector<2x32xf32>, vector<32x256xf32>, vector<2x256xf32> -> vector<2x256xf32>
    %c0_11 = arith.constant 0 : index
    %c0_12 = arith.constant 0 : index
    %11 = vector.load %arg5[%c0_11, %c0_12] : memref<1x256xf32, #tpu.memory_space<vmem>>, vector<1x256xf32>
    %12 = vector.broadcast %11 : vector<1x256xf32> to vector<2x256xf32>
    %13 = arith.addf %10, %12 : vector<2x256xf32>
    %14 = vector.extract_strided_slice %13 {offsets = [0, 0], sizes = [2, 192], strides = [1, 1]} : vector<2x256xf32> to vector<2x192xf32>
    %15 = arith.negf %14 : vector<2x192xf32>
    %16 = math.exp %15 : vector<2x192xf32>
    %cst_13 = arith.constant 1.000000e+00 : f32
    %17 = vector.broadcast %cst_13 : f32 to vector<2x192xf32>
    %18 = arith.addf %17, %16 : vector<2x192xf32>
    %19 = arith.divf %17, %18 : vector<2x192xf32>
    %20 = vector.extract_strided_slice %13 {offsets = [0, 192], sizes = [2, 64], strides = [1, 1]} : vector<2x256xf32> to vector<2x64xf32>
    %21 = math.tanh %20 : vector<2x64xf32>
    %22 = vector.extract_strided_slice %19 {offsets = [0, 64], sizes = [2, 64], strides = [1, 1]} : vector<2x192xf32> to vector<2x64xf32>
    %23 = arith.mulf %22, %21 : vector<2x64xf32>
    %24 = vector.extract_strided_slice %19 {offsets = [0, 128], sizes = [2, 64], strides = [1, 1]} : vector<2x192xf32> to vector<2x64xf32>
    %25 = math.tanh %23 : vector<2x64xf32>
    %26 = arith.mulf %24, %25 : vector<2x64xf32>
    %c0_14 = arith.constant 0 : index
    %c0_15 = arith.constant 0 : index
    %27 = vector.load %arg7[%c0_14, %c0_15] : memref<64x10xf32, #tpu.memory_space<vmem>>, vector<64x10xf32>
    %cst_16 = arith.constant dense<0.000000e+00> : vector<2x10xf32>
    %28 = tpu.matmul %26, %27, %cst_16 {dimension_numbers = #tpu.dot_dimension_numbers<[1], [0], [0], [1], [0, 0, 1, 1], [], []>} : vector<2x64xf32>, vector<64x10xf32>, vector<2x10xf32> -> vector<2x10xf32>
    %c0_17 = arith.constant 0 : index
    %c0_18 = arith.constant 0 : index
    %29 = vector.load %arg8[%c0_17, %c0_18] : memref<1x10xf32, #tpu.memory_space<vmem>>, vector<1x10xf32>
    %30 = vector.broadcast %29 : vector<1x10xf32> to vector<2x10xf32>
    %31 = arith.addf %28, %30 : vector<2x10xf32>
    %cst_19 = arith.constant 0.000000e+00 : f32
    %32 = vector.broadcast %cst_19 : f32 to vector<2x64xf32>
    %c0_i32 = arith.constant 0 : i32
    %c2_i32 = arith.constant 2 : i32
    %33 = arith.muli %c0_i32, %c2_i32 : i32
    %34 = arith.index_cast %33 : i32 to index
    %c0_20 = arith.constant 0 : index
    %35 = vector.load %arg10[%34, %c0_20] : memref<16x256xf32, #tpu.memory_space<vmem>>, vector<2x256xf32>
    %c0_21 = arith.constant 0 : index
    %c0_22 = arith.constant 0 : index
    %36 = vector.load %arg2[%c0_21, %c0_22] : memref<64x256xf32, #tpu.memory_space<vmem>>, vector<64x256xf32>
    %cst_23 = arith.constant dense<0.000000e+00> : vector<2x256xf32>
    %37 = tpu.matmul %32, %36, %cst_23 {dimension_numbers = #tpu.dot_dimension_numbers<[1], [0], [0], [1], [0, 0, 1, 1], [], []>} : vector<2x64xf32>, vector<64x256xf32>, vector<2x256xf32> -> vector<2x256xf32>
    %38 = arith.addf %35, %37 : vector<2x256xf32>
    %39 = vector.extract_strided_slice %38 {offsets = [0, 0], sizes = [2, 192], strides = [1, 1]} : vector<2x256xf32> to vector<2x192xf32>
    %40 = arith.negf %39 : vector<2x192xf32>
    %41 = math.exp %40 : vector<2x192xf32>
    %cst_24 = arith.constant 1.000000e+00 : f32
    %42 = vector.broadcast %cst_24 : f32 to vector<2x192xf32>
    %43 = arith.addf %42, %41 : vector<2x192xf32>
    %44 = arith.divf %42, %43 : vector<2x192xf32>
    %45 = vector.extract_strided_slice %38 {offsets = [0, 192], sizes = [2, 64], strides = [1, 1]} : vector<2x256xf32> to vector<2x64xf32>
    %46 = math.tanh %45 : vector<2x64xf32>
    %47 = vector.extract_strided_slice %44 {offsets = [0, 0], sizes = [2, 64], strides = [1, 1]} : vector<2x192xf32> to vector<2x64xf32>
    %48 = arith.mulf %47, %32 : vector<2x64xf32>
    %49 = vector.extract_strided_slice %44 {offsets = [0, 64], sizes = [2, 64], strides = [1, 1]} : vector<2x192xf32> to vector<2x64xf32>
    %50 = arith.mulf %49, %46 : vector<2x64xf32>
    %51 = arith.addf %48, %50 : vector<2x64xf32>
    %52 = vector.extract_strided_slice %44 {offsets = [0, 128], sizes = [2, 64], strides = [1, 1]} : vector<2x192xf32> to vector<2x64xf32>
    %53 = math.tanh %51 : vector<2x64xf32>
    %54 = arith.mulf %52, %53 : vector<2x64xf32>
    %c1_i32 = arith.constant 1 : i32
    %c2_i32_25 = arith.constant 2 : i32
    %55 = arith.muli %c1_i32, %c2_i32_25 : i32
    %56 = arith.index_cast %55 : i32 to index
    %c0_26 = arith.constant 0 : index
    %57 = vector.load %arg10[%56, %c0_26] : memref<16x256xf32, #tpu.memory_space<vmem>>, vector<2x256xf32>
    %c0_27 = arith.constant 0 : index
    %c0_28 = arith.constant 0 : index
    %58 = vector.load %arg2[%c0_27, %c0_28] : memref<64x256xf32, #tpu.memory_space<vmem>>, vector<64x256xf32>
    %cst_29 = arith.constant dense<0.000000e+00> : vector<2x256xf32>
    %59 = tpu.matmul %54, %58, %cst_29 {dimension_numbers = #tpu.dot_dimension_numbers<[1], [0], [0], [1], [0, 0, 1, 1], [], []>} : vector<2x64xf32>, vector<64x256xf32>, vector<2x256xf32> -> vector<2x256xf32>
    %60 = arith.addf %57, %59 : vector<2x256xf32>
    %61 = vector.extract_strided_slice %60 {offsets = [0, 0], sizes = [2, 192], strides = [1, 1]} : vector<2x256xf32> to vector<2x192xf32>
    %62 = arith.negf %61 : vector<2x192xf32>
    %63 = math.exp %62 : vector<2x192xf32>
    %cst_30 = arith.constant 1.000000e+00 : f32
    %64 = vector.broadcast %cst_30 : f32 to vector<2x192xf32>
    %65 = arith.addf %64, %63 : vector<2x192xf32>
    %66 = arith.divf %64, %65 : vector<2x192xf32>
    %67 = vector.extract_strided_slice %60 {offsets = [0, 192], sizes = [2, 64], strides = [1, 1]} : vector<2x256xf32> to vector<2x64xf32>
    %68 = math.tanh %67 : vector<2x64xf32>
    %69 = vector.extract_strided_slice %66 {offsets = [0, 0], sizes = [2, 64], strides = [1, 1]} : vector<2x192xf32> to vector<2x64xf32>
    %70 = arith.mulf %69, %51 : vector<2x64xf32>
    %71 = vector.extract_strided_slice %66 {offsets = [0, 64], sizes = [2, 64], strides = [1, 1]} : vector<2x192xf32> to vector<2x64xf32>
    %72 = arith.mulf %71, %68 : vector<2x64xf32>
    %73 = arith.addf %70, %72 : vector<2x64xf32>
    %74 = vector.extract_strided_slice %66 {offsets = [0, 128], sizes = [2, 64], strides = [1, 1]} : vector<2x192xf32> to vector<2x64xf32>
    %75 = math.tanh %73 : vector<2x64xf32>
    %76 = arith.mulf %74, %75 : vector<2x64xf32>
    %c2_i32_31 = arith.constant 2 : i32
    %c2_i32_32 = arith.constant 2 : i32
    %77 = arith.muli %c2_i32_31, %c2_i32_32 : i32
    %78 = arith.index_cast %77 : i32 to index
    %c0_33 = arith.constant 0 : index
    %79 = vector.load %arg10[%78, %c0_33] : memref<16x256xf32, #tpu.memory_space<vmem>>, vector<2x256xf32>
    %c0_34 = arith.constant 0 : index
    %c0_35 = arith.constant 0 : index
    %80 = vector.load %arg2[%c0_34, %c0_35] : memref<64x256xf32, #tpu.memory_space<vmem>>, vector<64x256xf32>
    %cst_36 = arith.constant dense<0.000000e+00> : vector<2x256xf32>
    %81 = tpu.matmul %76, %80, %cst_36 {dimension_numbers = #tpu.dot_dimension_numbers<[1], [0], [0], [1], [0, 0, 1, 1], [], []>} : vector<2x64xf32>, vector<64x256xf32>, vector<2x256xf32> -> vector<2x256xf32>
    %82 = arith.addf %79, %81 : vector<2x256xf32>
    %83 = vector.extract_strided_slice %82 {offsets = [0, 0], sizes = [2, 192], strides = [1, 1]} : vector<2x256xf32> to vector<2x192xf32>
    %84 = arith.negf %83 : vector<2x192xf32>
    %85 = math.exp %84 : vector<2x192xf32>
    %cst_37 = arith.constant 1.000000e+00 : f32
    %86 = vector.broadcast %cst_37 : f32 to vector<2x192xf32>
    %87 = arith.addf %86, %85 : vector<2x192xf32>
    %88 = arith.divf %86, %87 : vector<2x192xf32>
    %89 = vector.extract_strided_slice %82 {offsets = [0, 192], sizes = [2, 64], strides = [1, 1]} : vector<2x256xf32> to vector<2x64xf32>
    %90 = math.tanh %89 : vector<2x64xf32>
    %91 = vector.extract_strided_slice %88 {offsets = [0, 0], sizes = [2, 64], strides = [1, 1]} : vector<2x192xf32> to vector<2x64xf32>
    %92 = arith.mulf %91, %73 : vector<2x64xf32>
    %93 = vector.extract_strided_slice %88 {offsets = [0, 64], sizes = [2, 64], strides = [1, 1]} : vector<2x192xf32> to vector<2x64xf32>
    %94 = arith.mulf %93, %90 : vector<2x64xf32>
    %95 = arith.addf %92, %94 : vector<2x64xf32>
    %96 = vector.extract_strided_slice %88 {offsets = [0, 128], sizes = [2, 64], strides = [1, 1]} : vector<2x192xf32> to vector<2x64xf32>
    %97 = math.tanh %95 : vector<2x64xf32>
    %98 = arith.mulf %96, %97 : vector<2x64xf32>
    %c3_i32 = arith.constant 3 : i32
    %c2_i32_38 = arith.constant 2 : i32
    %99 = arith.muli %c3_i32, %c2_i32_38 : i32
    %100 = arith.index_cast %99 : i32 to index
    %c0_39 = arith.constant 0 : index
    %101 = vector.load %arg10[%100, %c0_39] : memref<16x256xf32, #tpu.memory_space<vmem>>, vector<2x256xf32>
    %c0_40 = arith.constant 0 : index
    %c0_41 = arith.constant 0 : index
    %102 = vector.load %arg2[%c0_40, %c0_41] : memref<64x256xf32, #tpu.memory_space<vmem>>, vector<64x256xf32>
    %cst_42 = arith.constant dense<0.000000e+00> : vector<2x256xf32>
    %103 = tpu.matmul %98, %102, %cst_42 {dimension_numbers = #tpu.dot_dimension_numbers<[1], [0], [0], [1], [0, 0, 1, 1], [], []>} : vector<2x64xf32>, vector<64x256xf32>, vector<2x256xf32> -> vector<2x256xf32>
    %104 = arith.addf %101, %103 : vector<2x256xf32>
    %105 = vector.extract_strided_slice %104 {offsets = [0, 0], sizes = [2, 192], strides = [1, 1]} : vector<2x256xf32> to vector<2x192xf32>
    %106 = arith.negf %105 : vector<2x192xf32>
    %107 = math.exp %106 : vector<2x192xf32>
    %cst_43 = arith.constant 1.000000e+00 : f32
    %108 = vector.broadcast %cst_43 : f32 to vector<2x192xf32>
    %109 = arith.addf %108, %107 : vector<2x192xf32>
    %110 = arith.divf %108, %109 : vector<2x192xf32>
    %111 = vector.extract_strided_slice %104 {offsets = [0, 192], sizes = [2, 64], strides = [1, 1]} : vector<2x256xf32> to vector<2x64xf32>
    %112 = math.tanh %111 : vector<2x64xf32>
    %113 = vector.extract_strided_slice %110 {offsets = [0, 0], sizes = [2, 64], strides = [1, 1]} : vector<2x192xf32> to vector<2x64xf32>
    %114 = arith.mulf %113, %95 : vector<2x64xf32>
    %115 = vector.extract_strided_slice %110 {offsets = [0, 64], sizes = [2, 64], strides = [1, 1]} : vector<2x192xf32> to vector<2x64xf32>
    %116 = arith.mulf %115, %112 : vector<2x64xf32>
    %117 = arith.addf %114, %116 : vector<2x64xf32>
    %118 = vector.extract_strided_slice %110 {offsets = [0, 128], sizes = [2, 64], strides = [1, 1]} : vector<2x192xf32> to vector<2x64xf32>
    %119 = math.tanh %117 : vector<2x64xf32>
    %120 = arith.mulf %118, %119 : vector<2x64xf32>
    %c4_i32 = arith.constant 4 : i32
    %c2_i32_44 = arith.constant 2 : i32
    %121 = arith.muli %c4_i32, %c2_i32_44 : i32
    %122 = arith.index_cast %121 : i32 to index
    %c0_45 = arith.constant 0 : index
    %123 = vector.load %arg10[%122, %c0_45] : memref<16x256xf32, #tpu.memory_space<vmem>>, vector<2x256xf32>
    %c0_46 = arith.constant 0 : index
    %c0_47 = arith.constant 0 : index
    %124 = vector.load %arg2[%c0_46, %c0_47] : memref<64x256xf32, #tpu.memory_space<vmem>>, vector<64x256xf32>
    %cst_48 = arith.constant dense<0.000000e+00> : vector<2x256xf32>
    %125 = tpu.matmul %120, %124, %cst_48 {dimension_numbers = #tpu.dot_dimension_numbers<[1], [0], [0], [1], [0, 0, 1, 1], [], []>} : vector<2x64xf32>, vector<64x256xf32>, vector<2x256xf32> -> vector<2x256xf32>
    %126 = arith.addf %123, %125 : vector<2x256xf32>
    %127 = vector.extract_strided_slice %126 {offsets = [0, 0], sizes = [2, 192], strides = [1, 1]} : vector<2x256xf32> to vector<2x192xf32>
    %128 = arith.negf %127 : vector<2x192xf32>
    %129 = math.exp %128 : vector<2x192xf32>
    %cst_49 = arith.constant 1.000000e+00 : f32
    %130 = vector.broadcast %cst_49 : f32 to vector<2x192xf32>
    %131 = arith.addf %130, %129 : vector<2x192xf32>
    %132 = arith.divf %130, %131 : vector<2x192xf32>
    %133 = vector.extract_strided_slice %126 {offsets = [0, 192], sizes = [2, 64], strides = [1, 1]} : vector<2x256xf32> to vector<2x64xf32>
    %134 = math.tanh %133 : vector<2x64xf32>
    %135 = vector.extract_strided_slice %132 {offsets = [0, 0], sizes = [2, 64], strides = [1, 1]} : vector<2x192xf32> to vector<2x64xf32>
    %136 = arith.mulf %135, %117 : vector<2x64xf32>
    %137 = vector.extract_strided_slice %132 {offsets = [0, 64], sizes = [2, 64], strides = [1, 1]} : vector<2x192xf32> to vector<2x64xf32>
    %138 = arith.mulf %137, %134 : vector<2x64xf32>
    %139 = arith.addf %136, %138 : vector<2x64xf32>
    %140 = vector.extract_strided_slice %132 {offsets = [0, 128], sizes = [2, 64], strides = [1, 1]} : vector<2x192xf32> to vector<2x64xf32>
    %141 = math.tanh %139 : vector<2x64xf32>
    %142 = arith.mulf %140, %141 : vector<2x64xf32>
    %c5_i32 = arith.constant 5 : i32
    %c2_i32_50 = arith.constant 2 : i32
    %143 = arith.muli %c5_i32, %c2_i32_50 : i32
    %144 = arith.index_cast %143 : i32 to index
    %c0_51 = arith.constant 0 : index
    %145 = vector.load %arg10[%144, %c0_51] : memref<16x256xf32, #tpu.memory_space<vmem>>, vector<2x256xf32>
    %c0_52 = arith.constant 0 : index
    %c0_53 = arith.constant 0 : index
    %146 = vector.load %arg2[%c0_52, %c0_53] : memref<64x256xf32, #tpu.memory_space<vmem>>, vector<64x256xf32>
    %cst_54 = arith.constant dense<0.000000e+00> : vector<2x256xf32>
    %147 = tpu.matmul %142, %146, %cst_54 {dimension_numbers = #tpu.dot_dimension_numbers<[1], [0], [0], [1], [0, 0, 1, 1], [], []>} : vector<2x64xf32>, vector<64x256xf32>, vector<2x256xf32> -> vector<2x256xf32>
    %148 = arith.addf %145, %147 : vector<2x256xf32>
    %149 = vector.extract_strided_slice %148 {offsets = [0, 0], sizes = [2, 192], strides = [1, 1]} : vector<2x256xf32> to vector<2x192xf32>
    %150 = arith.negf %149 : vector<2x192xf32>
    %151 = math.exp %150 : vector<2x192xf32>
    %cst_55 = arith.constant 1.000000e+00 : f32
    %152 = vector.broadcast %cst_55 : f32 to vector<2x192xf32>
    %153 = arith.addf %152, %151 : vector<2x192xf32>
    %154 = arith.divf %152, %153 : vector<2x192xf32>
    %155 = vector.extract_strided_slice %148 {offsets = [0, 192], sizes = [2, 64], strides = [1, 1]} : vector<2x256xf32> to vector<2x64xf32>
    %156 = math.tanh %155 : vector<2x64xf32>
    %157 = vector.extract_strided_slice %154 {offsets = [0, 0], sizes = [2, 64], strides = [1, 1]} : vector<2x192xf32> to vector<2x64xf32>
    %158 = arith.mulf %157, %139 : vector<2x64xf32>
    %159 = vector.extract_strided_slice %154 {offsets = [0, 64], sizes = [2, 64], strides = [1, 1]} : vector<2x192xf32> to vector<2x64xf32>
    %160 = arith.mulf %159, %156 : vector<2x64xf32>
    %161 = arith.addf %158, %160 : vector<2x64xf32>
    %162 = vector.extract_strided_slice %154 {offsets = [0, 128], sizes = [2, 64], strides = [1, 1]} : vector<2x192xf32> to vector<2x64xf32>
    %163 = math.tanh %161 : vector<2x64xf32>
    %164 = arith.mulf %162, %163 : vector<2x64xf32>
    %c6_i32 = arith.constant 6 : i32
    %c2_i32_56 = arith.constant 2 : i32
    %165 = arith.muli %c6_i32, %c2_i32_56 : i32
    %166 = arith.index_cast %165 : i32 to index
    %c0_57 = arith.constant 0 : index
    %167 = vector.load %arg10[%166, %c0_57] : memref<16x256xf32, #tpu.memory_space<vmem>>, vector<2x256xf32>
    %c0_58 = arith.constant 0 : index
    %c0_59 = arith.constant 0 : index
    %168 = vector.load %arg2[%c0_58, %c0_59] : memref<64x256xf32, #tpu.memory_space<vmem>>, vector<64x256xf32>
    %cst_60 = arith.constant dense<0.000000e+00> : vector<2x256xf32>
    %169 = tpu.matmul %164, %168, %cst_60 {dimension_numbers = #tpu.dot_dimension_numbers<[1], [0], [0], [1], [0, 0, 1, 1], [], []>} : vector<2x64xf32>, vector<64x256xf32>, vector<2x256xf32> -> vector<2x256xf32>
    %170 = arith.addf %167, %169 : vector<2x256xf32>
    %171 = vector.extract_strided_slice %170 {offsets = [0, 0], sizes = [2, 192], strides = [1, 1]} : vector<2x256xf32> to vector<2x192xf32>
    %172 = arith.negf %171 : vector<2x192xf32>
    %173 = math.exp %172 : vector<2x192xf32>
    %cst_61 = arith.constant 1.000000e+00 : f32
    %174 = vector.broadcast %cst_61 : f32 to vector<2x192xf32>
    %175 = arith.addf %174, %173 : vector<2x192xf32>
    %176 = arith.divf %174, %175 : vector<2x192xf32>
    %177 = vector.extract_strided_slice %170 {offsets = [0, 192], sizes = [2, 64], strides = [1, 1]} : vector<2x256xf32> to vector<2x64xf32>
    %178 = math.tanh %177 : vector<2x64xf32>
    %179 = vector.extract_strided_slice %176 {offsets = [0, 0], sizes = [2, 64], strides = [1, 1]} : vector<2x192xf32> to vector<2x64xf32>
    %180 = arith.mulf %179, %161 : vector<2x64xf32>
    %181 = vector.extract_strided_slice %176 {offsets = [0, 64], sizes = [2, 64], strides = [1, 1]} : vector<2x192xf32> to vector<2x64xf32>
    %182 = arith.mulf %181, %178 : vector<2x64xf32>
    %183 = arith.addf %180, %182 : vector<2x64xf32>
    %184 = vector.extract_strided_slice %176 {offsets = [0, 128], sizes = [2, 64], strides = [1, 1]} : vector<2x192xf32> to vector<2x64xf32>
    %185 = math.tanh %183 : vector<2x64xf32>
    %186 = arith.mulf %184, %185 : vector<2x64xf32>
    %c7_i32 = arith.constant 7 : i32
    %c2_i32_62 = arith.constant 2 : i32
    %187 = arith.muli %c7_i32, %c2_i32_62 : i32
    %188 = arith.index_cast %187 : i32 to index
    %c0_63 = arith.constant 0 : index
    %189 = vector.load %arg10[%188, %c0_63] : memref<16x256xf32, #tpu.memory_space<vmem>>, vector<2x256xf32>
    %c0_64 = arith.constant 0 : index
    %c0_65 = arith.constant 0 : index
    %190 = vector.load %arg2[%c0_64, %c0_65] : memref<64x256xf32, #tpu.memory_space<vmem>>, vector<64x256xf32>
    %cst_66 = arith.constant dense<0.000000e+00> : vector<2x256xf32>
    %191 = tpu.matmul %186, %190, %cst_66 {dimension_numbers = #tpu.dot_dimension_numbers<[1], [0], [0], [1], [0, 0, 1, 1], [], []>} : vector<2x64xf32>, vector<64x256xf32>, vector<2x256xf32> -> vector<2x256xf32>
    %192 = arith.addf %189, %191 : vector<2x256xf32>
    %193 = vector.extract_strided_slice %192 {offsets = [0, 0], sizes = [2, 192], strides = [1, 1]} : vector<2x256xf32> to vector<2x192xf32>
    %194 = arith.negf %193 : vector<2x192xf32>
    %195 = math.exp %194 : vector<2x192xf32>
    %cst_67 = arith.constant 1.000000e+00 : f32
    %196 = vector.broadcast %cst_67 : f32 to vector<2x192xf32>
    %197 = arith.addf %196, %195 : vector<2x192xf32>
    %198 = arith.divf %196, %197 : vector<2x192xf32>
    %199 = vector.extract_strided_slice %192 {offsets = [0, 192], sizes = [2, 64], strides = [1, 1]} : vector<2x256xf32> to vector<2x64xf32>
    %200 = math.tanh %199 : vector<2x64xf32>
    %201 = vector.extract_strided_slice %198 {offsets = [0, 0], sizes = [2, 64], strides = [1, 1]} : vector<2x192xf32> to vector<2x64xf32>
    %202 = arith.mulf %201, %183 : vector<2x64xf32>
    %203 = vector.extract_strided_slice %198 {offsets = [0, 64], sizes = [2, 64], strides = [1, 1]} : vector<2x192xf32> to vector<2x64xf32>
    %204 = arith.mulf %203, %200 : vector<2x64xf32>
    %205 = arith.addf %202, %204 : vector<2x64xf32>
    %206 = vector.extract_strided_slice %198 {offsets = [0, 128], sizes = [2, 64], strides = [1, 1]} : vector<2x192xf32> to vector<2x64xf32>
    %207 = math.tanh %205 : vector<2x64xf32>
    %208 = arith.mulf %206, %207 : vector<2x64xf32>
    %c8_i32 = arith.constant 8 : i32
    %c0_68 = arith.constant 0 : index
    %c0_69 = arith.constant 0 : index
    %209 = vector.load %arg6[%c0_68, %c0_69] : memref<64x10xf32, #tpu.memory_space<vmem>>, vector<64x10xf32>
    %cst_70 = arith.constant dense<0.000000e+00> : vector<2x10xf32>
    %210 = tpu.matmul %208, %209, %cst_70 {dimension_numbers = #tpu.dot_dimension_numbers<[1], [0], [0], [1], [0, 0, 1, 1], [], []>} : vector<2x64xf32>, vector<64x10xf32>, vector<2x10xf32> -> vector<2x10xf32>
    %211 = arith.addf %31, %210 : vector<2x10xf32>
    %c0_71 = arith.constant 0 : index
    %c0_72 = arith.constant 0 : index
    %212 = vector.load %arg9[%c0_71, %c0_72] : memref<2x10xf32, #tpu.memory_space<vmem>>, vector<2x10xf32>
    tpu.vector_store %arg9[%c0_71, %c0_72], %211 {strides = array<i32>} : memref<2x10xf32, #tpu.memory_space<vmem>>, vector<2x10xf32>,
    return
  }
}

</mosaic_0001>

<bundles_post_ra>
// kernel: tpu_custom_call.1
= control target key start
LH: loop header
LB: loop body
LE: loop exit
PB: predicated region body
PF: predicated region fallthrough
CT: control target
= control target key end

     0   :  { %14 = vsyncpa [#allocation4], 0  ;;  %s2149_s0 = inlined_call_operand.vmem [shape: f32[16,32], index: 0, kind: input, shape index: {}]   ;;  %s2150_s1 = inlined_call_operand.hbm [shape: f32[32,256], index: 1, kind: input, shape index: {}]   ;;  %s2151_s2 = inlined_call_operand.vmem [shape: f32[64,256], index: 2, kind: input, shape index: {}]   ;;  %s2152_s3 = inlined_call_operand.vmem [shape: f32[1,256], index: 3, kind: input, shape index: {}]   ;;  %s2153_s4 = inlined_call_operand.hbm [shape: f32[32,256], index: 4, kind: input, shape index: {}]   ;;  %s2154_s5 = inlined_call_operand.vmem [shape: f32[1,256], index: 5, kind: input, shape index: {}]   ;;  %s2155_s6 = inlined_call_operand.vmem [shape: f32[64,10], index: 6, kind: input, shape index: {}]   ;;  %s2156_s7 = inlined_call_operand.vmem [shape: f32[64,10], index: 7, kind: input, shape index: {}]   ;;  %s2157_s8 = inlined_call_operand.vmem [shape: f32[1,10], index: 8, kind: input, shape index: {}]   ;;  %s2158_s9 = inlined_call_operand.hbm [shape: f32[2,10], index: 9, kind: output, shape index: {}]  }
   0x1   :  { %15 = vsyncpa [#allocation7], 0 }
   0x2   :  { %16 = vsyncpa [#allocation5], 0  ;;  %s1800_s30 = smov [#allocation3]   ;;  %s1728_s13 = scalar_lea.hbm %s2150_s1, 1024 }
   0x3   :  { %s24_s10 = sshll.u32 %s1800_s30, 4  ;;  %p1729_p0 = scmp.ne.s32.totalorder %s2150_s1, %s1728_s13  ;;  %s25_s10 = int_to_ptr.vmem [resolvable:$true] %s24_s10 }
   0x4   :  { %p1732_p1 = scmp.lt.u32.totalorder %s1728_s13, %s2150_s1 }
   0x6   :  { %p1734_p2 = pnand %p1732_p1, %p1729_p0 }
   0x8   :  { %1737 = shalt.err (!%p1734_p2)
}
   0x9   :  { %s1738_s18 = scalar_lea.vmem %s25_s10, 1024  ;;  %p1743_p4 = scmp.lt.s32.totalorder %s25_s10, %s25_s10 }
   0xa   :  { %p1739_p3 = scmp.ne.s32.totalorder %s25_s10, %s1738_s18  ;;  %p1744_p5 = scmp.lt.s32.totalorder %s1738_s18, %s1738_s18 }
   0xc   :  { %p1745_p6 = por %p1744_p5, %p1743_p4 }
   0xe   :  { %p1746_p7 = pnand %p1745_p6, %p1739_p3 }
  0x10   :  { %1749 = shalt.err (!%p1746_p7)
}
  0x11   :  { %s1801_s19 = smov 256   ;;  %s1802_s20 = smov 16  }
  0x12   :  { %30 = dma.hbm_to_vmem [thread:$0]  %s2150_s1, 1024, %s25_s10, [#allocation4], %s1801_s19, %s1801_s19, %s1802_s20  }
  0x13   :  { %s1803_s23 = smov [#allocation6]   ;;  %s1750_s27 = scalar_lea.hbm %s2153_s4, 1024 }
  0x14   :  { %s40_s24 = sshll.u32 %s1803_s23, 4  ;;  %p1751_p8 = scmp.ne.s32.totalorder %s2153_s4, %s1750_s27  ;;  %s41_s24 = int_to_ptr.vmem [resolvable:$true] %s40_s24 }
  0x15   :  { %p1754_p9 = scmp.lt.u32.totalorder %s1750_s27, %s2153_s4 }
  0x17   :  { %p1756_p10 = pnand %p1754_p9, %p1751_p8 }
  0x19   :  { %1759 = shalt.err (!%p1756_p10)
}
  0x1a   :  { %s1760_s12 = scalar_lea.vmem %s41_s24, 1024  ;;  %p1765_p12 = scmp.lt.s32.totalorder %s41_s24, %s41_s24 }
  0x1b   :  { %p1761_p11 = scmp.ne.s32.totalorder %s41_s24, %s1760_s12  ;;  %p1766_p13 = scmp.lt.s32.totalorder %s1760_s12, %s1760_s12 }
  0x1d   :  { %p1767_p0 = por %p1766_p13, %p1765_p12 }
  0x1f   :  { %p1768_p1 = pnand %p1767_p0, %p1761_p11 }
  0x21   :  { %1771 = shalt.err (!%p1768_p1)
}
  0x22   :  { %46 = dma.hbm_to_vmem [thread:$0]  %s2153_s4, 1024, %s41_s24, [#allocation7], %s1801_s19, %s1801_s19, %s1802_s20  }
  0x23   :  { %1794 = dma.done.wait [#allocation4], 1024  }
  0x24   :  { %1795 = vsyncadd [#allocation4], 4294966272 }
  0x25   :  { %1796 = dma.done.wait [#allocation7], 1024  }
  0x26   :  { %1797 = vsyncadd [#allocation7], 4294966272  ;;  %v1804_v0 = vmov 0.0   ;;  %v173_v1 = vld [vmem:[#allocation6 + $0x8] sm:$0xff]  ;;  %v175_v2 = vld [vmem:[#allocation6 + $0x18] sm:$0xff]  ;;  %vm83_vm0 = vcmask 261120   ;;  %v73_v30 = vlaneseq }
  0x27   :  { %259 = vmatprep.mubr.f32.mxu1 %v1804_v0  ;;  %154 = vmatprep.mubr.f32.mxu0 %v1804_v0  ;;  %v172_v3 = vld [vmem:[#allocation6] sm:$0xff]  ;;  %v1449_v4 = vpack.c.bf16 %v175_v2, %v173_v1  ;;  %v174_v5 = vld [vmem:[#allocation6 + $0x10] sm:$0xff]  ;;  %v177_v6 = vld [vmem:[#allocation6 + $0x28] sm:$0xff]  ;;  %v1805_v17 = vmov 0.0|0.0   ;;  %vm1806_vm1 = vmmov 0   ;;  %s1807_s4 = smov 64  }
  0x28   :  { %v179_v7 = vld [vmem:[#allocation6 + $0x38] sm:$0xff]  ;;  %v1451_v8 = vpack.c.bf16 %v174_v5, %v172_v3  ;;  %v176_v10 = vld [vmem:[#allocation6 + $0x20] sm:$0xff]  ;;  %v178_v11 = vld [vmem:[#allocation6 + $0x30] sm:$0xff]  ;;  %v1917_v31 = vshrl.u32 %v73_v30, 7  ;;  %vm301_vm2 = vcmask 523264   ;;  %s1808_s1 = smov [#allocation8]  }
  0x29   :  { %v1453_v9 = vpack.c.bf16 %v179_v7, %v177_v6  ;;  %1450 = vmatprep.subr.bf16.mxu1 %v1449_v4  ;;  %v1455_v12 = vpack.c.bf16 %v178_v11, %v176_v10  ;;  %v171_v13 = vld [vmem:[%s2149_s0 + $0xe] sm:$0x3]  ;;  %v286_v14 = vld [vmem:[%s2156_s7] sm:$0xff]  ;;  %v288_v16 = vld [vmem:[%s2156_s7 + $0x10] sm:$0xff]  ;;  %s1344_s10 = sshll.u32 %s1808_s1, 4  ;;  %vm1336_vm3 = vcmask 74752   ;;  %s1345_s10 = int_to_ptr.vmem [resolvable:$true] %s1344_s10 }
  0x2a   :  { %1452 = vmatpush1.bf16.msra.mxu1 %v1451_v8  ;;  %v287_v15 = vld [vmem:[%s2156_s7 + $0x8] sm:$0xff]  ;;  %v289_v19 = vld [vmem:[%s2156_s7 + $0x18] sm:$0xff]  ;;  %v290_v24 = vld [vmem:[%s2156_s7 + $0x20] sm:$0xff]  ;;  %v75_v32 = vsub.s32 0, %v1917_v31  ;;  %v79_v39 = vsub.s32 1, %v1917_v31  ;;  %p1777_p3 = scmp.lt.s32.totalorder %s1345_s10, %s1345_s10 }
  0x2b   :  { %1454 = vmatprep.subr.bf16.mxu1 %v1453_v9  ;;  %v1458_v18 = vpack.c.bf16 %v287_v15, %v286_v14  ;;  %v64_v20 = vld [vmem:[#allocation3 + $0x8] sm:$0xff]  ;;  %v66_v21 = vld [vmem:[#allocation3 + $0x18] sm:$0xff]  ;;  %v1461_v22 = vpack.c.bf16 %v289_v19, %v288_v16  ;;  %v292_v27 = vld [vmem:[%s2156_s7 + $0x30] sm:$0xff] }
  0x2c   :  { %v1441_v23 = vpack.c.bf16 %v66_v21, %v64_v20  ;;  %v291_v25 = vld [vmem:[%s2156_s7 + $0x28] sm:$0xff]  ;;  %v293_v28 = vld [vmem:[%s2156_s7 + $0x38] sm:$0xff]  ;;  %v180_v33 = vld [vmem:[%s2154_s5] sm:$0x3] }
  0x2d   :  { %v1464_v26 = vpack.c.bf16 %v291_v25, %v290_v24  ;;  %v1467_v29 = vpack.c.bf16 %v293_v28, %v292_v27  ;;  %v185_v34 = vrot.slane %v180_v33, %v75_v32  ;;  %v189_v40 = vrot.slane %v180_v33, %v79_v39  ;;  %v63_v44 = vld [vmem:[#allocation3] sm:$0xff]  ;;  %v65_v45 = vld [vmem:[#allocation3 + $0x10] sm:$0xff]  ;;  %v378_v48 = vld [vmem:[%s2151_s2 + $0x8] sm:$0xff] }
  0x2e   :  { %1456 = vmatpush1.bf16.msra.mxu1 %v1455_v12  ;;  %1442 = vmatprep.subr.bf16.mxu0 %v1441_v23  ;;  %v1443_v46 = vpack.c.bf16 %v65_v45, %v63_v44  ;;  %v380_v49 = vld [vmem:[%s2151_s2 + $0x18] sm:$0xff]  ;;  %v68_v52 = vld [vmem:[#allocation3 + $0x28] sm:$0xff]  ;;  %v67_v56 = vld [vmem:[#allocation3 + $0x20] sm:$0xff] }
  0x2f   :  { %1457 = vmatprep.subr.bf16.mxu1 %v1805_v17  ;;  %v1934_v51 = vpack.c.bf16 %v380_v49, %v378_v48  ;;  %v70_v53 = vld [vmem:[#allocation3 + $0x38] sm:$0xff]  ;;  %v69_v57 = vld [vmem:[#allocation3 + $0x30] sm:$0xff]  ;;  %v377_v59 = vld [vmem:[%s2151_s2] sm:$0xff] }
  0x30   :  { %1444 = vmatpush1.bf16.msra.mxu0 %v1443_v46  ;;  %v1445_v55 = vpack.c.bf16 %v70_v53, %v68_v52  ;;  %v1447_v58 = vpack.c.bf16 %v69_v57, %v67_v56  ;;  %v379_v60 = vld [vmem:[%s2151_s2 + $0x10] sm:$0xff]  ;;  %v382_v61 = vld [vmem:[%s2151_s2 + $0x28] sm:$0xff]  ;;  %v384_v62 = vld [vmem:[%s2151_s2 + $0x38] sm:$0xff] }
  0x31   :  { %1356 = vmatmul.mubr.msk.f32.vlgmr.msra.gmra.mrb[0].mxu1 %vm83_vm0, %v171_v13  ;;  %v61_v63 = vld [vmem:[%s2149_s0] sm:$0xff]  ;;  %v1955_v1 = vpack.c.bf16 %v379_v60, %v377_v59  ;;  %v1957_v2 = vpack.c.bf16 %v384_v62, %v382_v61  ;;  %v383_v4 = vld [vmem:[%s2151_s2 + $0x30] sm:$0xff]  ;;  %v386_v5 = vld [vmem:[%s2151_s2 + $0x48] sm:$0xff] }
  0x32   :  { %1459 = vmatpush3.bf16.msra.mxu1 %v1458_v18  ;;  %1419 = vmatprep.mubr.msk.f32.mxu1 %vm1806_vm1, %v1804_v0  ;;  %v381_v3 = vld [vmem:[%s2151_s2 + $0x20] sm:$0xff]  ;;  %v388_v6 = vld [vmem:[%s2151_s2 + $0x58] sm:$0xff]  ;;  %v387_v10 = vld [vmem:[%s2151_s2 + $0x50] sm:$0xff] }
  0x33   :  { %1460 = vmatprep.subr.bf16.mxu1 %v1805_v17  ;;  %1446 = vmatprep.subr.bf16.mxu0 %v1445_v55  ;;  %v1975_v7 = vpack.c.bf16 %v383_v4, %v381_v3  ;;  %v1977_v8 = vpack.c.bf16 %v388_v6, %v386_v5  ;;  %v385_v9 = vld [vmem:[%s2151_s2 + $0x40] sm:$0xff]  ;;  %v390_v12 = vld [vmem:[%s2151_s2 + $0x68] sm:$0xff]  ;;  %v392_v13 = vld [vmem:[%s2151_s2 + $0x78] sm:$0xff] }
  0x34   :  { %1448 = vmatpush1.bf16.msra.mxu0 %v1447_v58  ;;  %v1994_v14 = vpack.c.bf16 %v387_v10, %v385_v9  ;;  %v1996_v15 = vpack.c.bf16 %v392_v13, %v390_v12  ;;  %v389_v16 = vld [vmem:[%s2151_s2 + $0x60] sm:$0xff]  ;;  %v391_v18 = vld [vmem:[%s2151_s2 + $0x70] sm:$0xff]  ;;  %v62_v45 = vld [vmem:[%s2149_s0 + $0x8] sm:$0xff] }
  0x35   :  { %1486 = vmatprep.subr.bf16.mxu0 %v1934_v51  ;;  %v2006_v19 = vpack.c.bf16 %v391_v18, %v389_v16 }
  0x36   :  { %1462 = vmatpush3.bf16.msra.mxu1 %v1461_v22 }
  0x37   :  { %1463 = vmatprep.subr.bf16.mxu1 %v1805_v17  ;;  %1354 = vmatmul.mubr.msk.f32.vlgmr.msra.gmra.mrb[0].mxu0 %vm83_vm0, %v61_v63 }
  0x38   :  { %1488 = vmatpush1.bf16.msra.mxu0 %v1955_v1  ;;  %160 = vmatprep.mubr.f32.mxu0 %v1804_v0 }
  0x39   :  { %1490 = vmatprep.subr.bf16.mxu0 %v1957_v2 }
  0x3a   :  { %1465 = vmatpush3.bf16.msra.mxu1 %v1464_v26  ;;  %v71_v26 = vld [vmem:[%s2152_s3] sm:$0x3] }
  0x3b   :  { %1466 = vmatprep.subr.bf16.mxu1 %v1805_v17  ;;  %v76_v27 = vrot.slane %v71_v26, %v75_v32  ;;  %v80_v28 = vrot.slane %v71_v26, %v79_v39  ;;  %1355 = vmatmul.mubr.msk.f32.gmra.mrb[2].mxu0 %vm83_vm0, %v62_v45 }
  0x3c   :  { %1492 = vmatpush1.bf16.msra.mxu0 %v1975_v7  ;;  %560 = vmatprep.mubr.f32.mxu0 %v1804_v0 }
  0x3d   :  { %1494 = vmatprep.subr.bf16.mxu0 %v1977_v8 }
  0x3e   :  { %1468 = vmatpush3.bf16.msra.mxu1 %v1467_v29 }
  0x3f   :  { %1470 = vmatprep.subr.bf16.mxu1 %v1934_v51 }
  0x40   :  { %1496 = vmatpush1.bf16.msra.mxu0 %v1994_v14 }
  0x41   :  { %1498 = vmatprep.subr.bf16.mxu0 %v1996_v15 }
  0x44   :  { %1500 = vmatpush1.bf16.msra.mxu0 %v2006_v19 }
  0x45   :  { %1518 = vmatprep.subr.bf16.mxu0 %v1934_v51 }
 0x104   :  { %v261_v35 = vpop.f32.mrb[0].mxu1 }
 0x105   :  { %v262_v36 = vadd.f32 %v261_v35, %v185_v34  ;;  %v263_v37 = vpop.f32.mrb[1].mxu1 }
 0x106   :  { %v264_v41 = vadd.f32 %v263_v37, %v189_v40 }
 0x107   :  { %v1357_v38 = vmul.f32 -1.442695, %v262_v36 }
 0x108   :  { %v1358_v20 = vmul.f32 -1.442695, %v264_v41 }
 0x109   :  { %1620 = vpow2.f32 %v1357_v38 }
 0x10a   :  { %1622 = vtanh.f32 %v264_v41  ;;  %v156_v29 = vpop.f32.mrb[0].mxu0 }
 0x10b   :  { %v157_v30 = vadd.f32 %v156_v29, %v76_v27  ;;  %v158_v33 = vpop.f32.mrb[1].mxu0 }
 0x10c   :  { %v159_v34 = vadd.f32 %v158_v33, %v80_v28 }
 0x10d   :  { %167 = vst [vmem:[#allocation2] sm:$0xff] %v157_v30 }
 0x10e   :  { %168 = vst [vmem:[#allocation2 + $0x8] sm:$0xff] %v159_v34  ;;  %v162_v58 = vpop.f32.mrb[2].mxu0 }
 0x10f   :  { %v163_v59 = vadd.f32 %v162_v58, %v76_v27  ;;  %v164_v60 = vpop.f32.mrb[3].mxu0 }
 0x110   :  { %v165_v61 = vadd.f32 %v164_v60, %v80_v28 }
 0x111   :  { %169 = vst [vmem:[#allocation2 + $0x10] sm:$0xff] %v163_v59 }
 0x112   :  { %170 = vst [vmem:[#allocation2 + $0x18] sm:$0xff] %v165_v61 }
 0x113   :  { %v1621_v42 = vpop.eup %1620 }
 0x114   :  { %v272_v43 = vadd.f32 1.0, %v1621_v42  ;;  %v1623_v47 = vpop.eup %1622  ;;  %v375_v37 = vld [vmem:[#allocation2] sm:$0x3]  ;;  %v491_v4 = vld [vmem:[#allocation2] sm:$0xc] }
 0x115   :  { %v492_v10 = vld [vmem:[#allocation2 + $0x8] sm:$0xc] }
 0x116   :  { %1624 = vrcp.f32 %v272_v43  ;;  %v376_v43 = vld [vmem:[#allocation2 + $0x8] sm:$0x3] }
 0x120   :  { %v1625_v50 = vpop.eup %1624 }
 0x121   :  { %v279_v54 = vmul.f32 %v1625_v50, %v1623_v47 }
 0x123   :  { %1626 = vtanh.f32 %v279_v54 }
 0x124   :  { %1628 = vpow2.f32 %v1358_v20 }
 0x12d   :  { %v1627_v11 = vpop.eup %1626 }
 0x12e   :  { %282 = vrot.lane.b32.xlu0 %v1627_v11, %s1807_s4  ;;  %v1629_v21 = vpop.eup %1628 }
 0x12f   :  { %v273_v22 = vadd.f32 1.0, %v1629_v21 }
 0x131   :  { %1630 = vrcp.f32 %v273_v22 }
 0x13b   :  { %v1631_v23 = vpop.eup %1630 }
 0x1a0   :  { %v283_v24 = vpop.permute.xlu0 %282 }
 0x1a1   :  { %v285_v25 = vmul.f32 %v1631_v23, %v283_v24 }
 0x1a3   :  { %1420 = vmatmul.mubr.msk.f32.vlgmr.msra.gmra.mrb[2].mxu1 %vm301_vm2, %v285_v25 }
 0x1a4   :  { %1472 = vmatpush1.bf16.msra.mxu1 %v1955_v1  ;;  %460 = vmatprep.mubr.f32.mxu1 %v1804_v0 }
 0x1a5   :  { %1474 = vmatprep.subr.bf16.mxu1 %v1957_v2 }
 0x1a8   :  { %1476 = vmatpush1.bf16.msra.mxu1 %v1975_v7 }
 0x1a9   :  { %1478 = vmatprep.subr.bf16.mxu1 %v1977_v8 }
 0x1ac   :  { %1480 = vmatpush1.bf16.msra.mxu1 %v1994_v14 }
 0x1ad   :  { %1482 = vmatprep.subr.bf16.mxu1 %v1996_v15 }
 0x1b0   :  { %1484 = vmatpush1.bf16.msra.mxu1 %v2006_v19 }
 0x1b1   :  { %1502 = vmatprep.subr.bf16.mxu1 %v1934_v51 }
 0x1b3   :  { %461 = vmatmul.mubr.f32.vlgmr.msra.gmra.mrb[4].mxu1 %v1804_v0 }
 0x1b4   :  { %1504 = vmatpush1.bf16.msra.mxu1 %v1955_v1  ;;  %670 = vmatprep.mubr.f32.mxu1 %v1804_v0 }
 0x1b5   :  { %1506 = vmatprep.subr.bf16.mxu1 %v1957_v2 }
 0x1b8   :  { %1508 = vmatpush1.bf16.msra.mxu1 %v1975_v7 }
 0x1b9   :  { %1510 = vmatprep.subr.bf16.mxu1 %v1977_v8 }
 0x1bc   :  { %1512 = vmatpush1.bf16.msra.mxu1 %v1994_v14 }
 0x1bd   :  { %1514 = vmatprep.subr.bf16.mxu1 %v1996_v15 }
 0x1c0   :  { %1516 = vmatpush1.bf16.msra.mxu1 %v2006_v19 }
 0x1c1   :  { %1534 = vmatprep.subr.bf16.mxu1 %v1934_v51 }
 0x276   :  { %v2037_v35 = vpop.f32.mrb[2].mxu1 }
 0x277   :  { %v1421_v36 = vpop.f32.mrb[3].mxu1 }
 0x286   :  { %v462_v38 = vpop.f32.mrb[4].mxu1 }
 0x287   :  { %v467_v40 = vadd.f32 %v462_v38, %v375_v37  ;;  %v464_v41 = vpop.f32.mrb[5].mxu1  ;;  %v600_v38 = vld [vmem:[#allocation2] sm:$0x30] }
 0x288   :  { %v468_v32 = vadd.f32 %v464_v41, %v376_v43  ;;  %v601_v43 = vld [vmem:[#allocation2 + $0x8] sm:$0x30] }
 0x289   :  { %v1361_v42 = vmul.f32 -1.442695, %v467_v40 }
 0x28a   :  { %v1362_v48 = vmul.f32 -1.442695, %v468_v32 }
 0x28b   :  { %1632 = vpow2.f32 %v1361_v42 }
 0x28c   :  { %1634 = vtanh.f32 %v468_v32 }
 0x295   :  { %v1633_v44 = vpop.eup %1632 }
 0x296   :  { %v475_v31 = vadd.f32 1.0, %v1633_v44  ;;  %v1635_v39 = vpop.eup %1634 }
 0x298   :  { %1636 = vrcp.f32 %v475_v31 }
 0x299   :  { %1638 = vpow2.f32 %v1362_v48 }
 0x2a2   :  { %v1637_v46 = vpop.eup %1636 }
 0x2a3   :  { %v483_v47 = vmul.f32 %v1637_v46, %v1635_v39  ;;  %v1639_v49 = vpop.eup %1638  ;;  %v482_v52 = vmul.f32 0.0, %v1637_v46 }
 0x2a4   :  { %v476_v50 = vadd.f32 1.0, %v1639_v49 }
 0x2a5   :  { %485 = vrot.lane.b32.xlu0 %v483_v47, %s1807_s4 }
 0x2a6   :  { %1640 = vrcp.f32 %v476_v50 }
 0x2b0   :  { %v1641_v55 = vpop.eup %1640 }
 0x317   :  { %v486_v53 = vpop.permute.xlu0 %485 }
 0x318   :  { %v488_v54 = vadd.f32 %v486_v53, %v482_v52 }
 0x31a   :  { %1642 = vtanh.f32 %v488_v54  ;;  %v589_v18 = vrot.slane %v488_v54, 6 }
 0x324   :  { %v1643_v56 = vpop.eup %1642 }
 0x325   :  { %v490_v57 = vmul.f32 %v1643_v56, %v1641_v55 }
 0x327   :  { %1363 = vmatmul.mubr.msk.f32.vlgmr.msra.gmra.mrb[4].mxu0 %vm301_vm2, %v490_v57 }
 0x328   :  { %1520 = vmatpush1.bf16.msra.mxu0 %v1955_v1  ;;  %780 = vmatprep.mubr.f32.mxu0 %v1804_v0 }
 0x329   :  { %1522 = vmatprep.subr.bf16.mxu0 %v1957_v2 }
 0x32c   :  { %1524 = vmatpush1.bf16.msra.mxu0 %v1975_v7 }
 0x32d   :  { %1526 = vmatprep.subr.bf16.mxu0 %v1977_v8 }
 0x330   :  { %1528 = vmatpush1.bf16.msra.mxu0 %v1994_v14 }
 0x331   :  { %1530 = vmatprep.subr.bf16.mxu0 %v1996_v15 }
 0x334   :  { %1532 = vmatpush1.bf16.msra.mxu0 %v2006_v19 }
 0x335   :  { %1550 = vmatprep.subr.bf16.mxu0 %v1934_v51 }
 0x3fa   :  { %v562_v62 = vpop.f32.mrb[4].mxu0 }
 0x3fb   :  { %v569_v63 = vrot.slane %v562_v62, 6  ;;  %v564_v3 = vpop.f32.mrb[5].mxu0  ;;  %v710_v62 = vld [vmem:[#allocation2] sm:$0xc0] }
 0x3fc   :  { %v570_v9 = vrot.slane %v564_v3, 6 }
 0x3fd   :  { %v573_v5 = vadd.f32 %v569_v63, %v491_v4 }
 0x3fe   :  { %v574_v11 = vadd.f32 %v570_v9, %v492_v10 }
 0x3ff   :  { %v1364_v6 = vmul.f32 -1.442695, %v573_v5  ;;  %v711_v5 = vld [vmem:[#allocation2 + $0x8] sm:$0xc0] }
 0x400   :  { %v1365_v23 = vmul.f32 -1.442695, %v574_v11 }
 0x401   :  { %1644 = vpow2.f32 %v1364_v6 }
 0x402   :  { %1646 = vtanh.f32 %v574_v11 }
 0x40b   :  { %v1645_v12 = vpop.eup %1644 }
 0x40c   :  { %v581_v13 = vadd.f32 1.0, %v1645_v12  ;;  %v1647_v16 = vpop.eup %1646 }
 0x40e   :  { %1648 = vrcp.f32 %v581_v13 }
 0x40f   :  { %1650 = vpow2.f32 %v1365_v23 }
 0x418   :  { %v1649_v20 = vpop.eup %1648 }
 0x419   :  { %v592_v21 = vmul.f32 %v1649_v20, %v1647_v16  ;;  %v591_v22 = vmul.f32 %v1649_v20, %v589_v18  ;;  %v1651_v24 = vpop.eup %1650 }
 0x41a   :  { %v582_v25 = vadd.f32 1.0, %v1651_v24 }
 0x41b   :  { %594 = vrot.lane.b32.xlu1 %v592_v21, %s1807_s4 }
 0x41c   :  { %1652 = vrcp.f32 %v582_v25 }
 0x426   :  { %v1653_v28 = vpop.eup %1652 }
 0x48d   :  { %v595_v26 = vpop.permute.xlu1 %594 }
 0x48e   :  { %v597_v27 = vadd.f32 %v595_v26, %v591_v22 }
 0x490   :  { %1654 = vtanh.f32 %v597_v27  ;;  %v699_v45 = vrot.slane %v597_v27, 6 }
 0x49a   :  { %v1655_v29 = vpop.eup %1654 }
 0x49b   :  { %v599_v30 = vmul.f32 %v1655_v29, %v1653_v28  ;;  %v820_v28 = vld [vmem:[#allocation2 + $0x10] sm:$0x3] }
 0x49d   :  { %v603_v33 = vrot.slane %v599_v30, 2 }
 0x49f   :  { %1366 = vmatmul.mubr.msk.f32.vlgmr.msra.gmra.mrb[6].mxu1 %vm301_vm2, %v603_v33 }
 0x4a0   :  { %1536 = vmatpush1.bf16.msra.mxu1 %v1955_v1  ;;  %890 = vmatprep.mubr.f32.mxu1 %v1804_v0 }
 0x4a1   :  { %1538 = vmatprep.subr.bf16.mxu1 %v1957_v2 }
 0x4a4   :  { %1540 = vmatpush1.bf16.msra.mxu1 %v1975_v7 }
 0x4a5   :  { %1542 = vmatprep.subr.bf16.mxu1 %v1977_v8 }
 0x4a8   :  { %1544 = vmatpush1.bf16.msra.mxu1 %v1994_v14 }
 0x4a9   :  { %1546 = vmatprep.subr.bf16.mxu1 %v1996_v15 }
 0x4ac   :  { %1548 = vmatpush1.bf16.msra.mxu1 %v2006_v19 }
 0x4ad   :  { %1566 = vmatprep.subr.bf16.mxu1 %v1934_v51 }
 0x572   :  { %v672_v34 = vpop.f32.mrb[6].mxu1 }
 0x573   :  { %v679_v36 = vrot.slane %v672_v34, 4  ;;  %v674_v37 = vpop.f32.mrb[7].mxu1 }
 0x574   :  { %v680_v42 = vrot.slane %v674_v37, 4 }
 0x575   :  { %v683_v40 = vadd.f32 %v679_v36, %v600_v38  ;;  %v821_v36 = vld [vmem:[#allocation2 + $0x18] sm:$0x3] }
 0x576   :  { %v684_v32 = vadd.f32 %v680_v42, %v601_v43 }
 0x577   :  { %v1367_v41 = vmul.f32 -1.442695, %v683_v40 }
 0x578   :  { %v1368_v49 = vmul.f32 -1.442695, %v684_v32 }
 0x579   :  { %1656 = vpow2.f32 %v1367_v41 }
 0x57a   :  { %1658 = vtanh.f32 %v684_v32 }
 0x583   :  { %v1657_v44 = vpop.eup %1656 }
 0x584   :  { %v691_v31 = vadd.f32 1.0, %v1657_v44  ;;  %v1659_v39 = vpop.eup %1658 }
 0x586   :  { %1660 = vrcp.f32 %v691_v31 }
 0x587   :  { %1662 = vpow2.f32 %v1368_v49 }
 0x590   :  { %v1661_v46 = vpop.eup %1660 }
 0x591   :  { %v702_v47 = vmul.f32 %v1661_v46, %v1659_v39  ;;  %v701_v48 = vmul.f32 %v1661_v46, %v699_v45  ;;  %v1663_v50 = vpop.eup %1662 }
 0x592   :  { %v692_v52 = vadd.f32 1.0, %v1663_v50 }
 0x593   :  { %704 = vrot.lane.b32.xlu1 %v702_v47, %s1807_s4 }
 0x594   :  { %1664 = vrcp.f32 %v692_v52 }
 0x59e   :  { %v1665_v55 = vpop.eup %1664 }
 0x605   :  { %v705_v53 = vpop.permute.xlu1 %704 }
 0x606   :  { %v707_v54 = vadd.f32 %v705_v53, %v701_v48 }
 0x608   :  { %1666 = vtanh.f32 %v707_v54  ;;  %v809_v12 = vrot.slane %v707_v54, 6 }
 0x612   :  { %v1667_v56 = vpop.eup %1666 }
 0x613   :  { %v709_v57 = vmul.f32 %v1667_v56, %v1665_v55 }
 0x615   :  { %v713_v58 = vrot.slane %v709_v57, 4  ;;  %v925_v57 = vld [vmem:[#allocation2 + $0x18] sm:$0xc] }
 0x617   :  { %1369 = vmatmul.mubr.msk.f32.vlgmr.msra.gmra.mrb[6].mxu0 %vm301_vm2, %v713_v58 }
 0x618   :  { %1552 = vmatpush1.bf16.msra.mxu0 %v1955_v1  ;;  %993 = vmatprep.mubr.f32.mxu0 %v1804_v0 }
 0x619   :  { %1554 = vmatprep.subr.bf16.mxu0 %v1957_v2 }
 0x61c   :  { %1556 = vmatpush1.bf16.msra.mxu0 %v1975_v7 }
 0x61d   :  { %1558 = vmatprep.subr.bf16.mxu0 %v1977_v8 }
 0x620   :  { %1560 = vmatpush1.bf16.msra.mxu0 %v1994_v14 }
 0x621   :  { %1562 = vmatprep.subr.bf16.mxu0 %v1996_v15 }
 0x624   :  { %1564 = vmatpush1.bf16.msra.mxu0 %v2006_v19 }
 0x625   :  { %1582 = vmatprep.subr.bf16.mxu0 %v1934_v51 }
 0x6ea   :  { %v782_v59 = vpop.f32.mrb[6].mxu0 }
 0x6eb   :  { %v789_v60 = vrot.slane %v782_v59, 2  ;;  %v784_v61 = vpop.f32.mrb[7].mxu0 }
 0x6ec   :  { %v790_v4 = vrot.slane %v784_v61, 2 }
 0x6ed   :  { %v793_v63 = vadd.f32 %v789_v60, %v710_v62 }
 0x6ee   :  { %v794_v6 = vadd.f32 %v790_v4, %v711_v5 }
 0x6ef   :  { %v1370_v3 = vmul.f32 -1.442695, %v793_v63 }
 0x6f0   :  { %v1371_v51 = vmul.f32 -1.442695, %v794_v6 }
 0x6f1   :  { %1668 = vpow2.f32 %v1370_v3 }
 0x6f2   :  { %1670 = vtanh.f32 %v794_v6 }
 0x6fb   :  { %v1669_v9 = vpop.eup %1668 }
 0x6fc   :  { %v801_v10 = vadd.f32 1.0, %v1669_v9  ;;  %v1671_v11 = vpop.eup %1670 }
 0x6fe   :  { %1672 = vrcp.f32 %v801_v10 }
 0x6ff   :  { %1674 = vpow2.f32 %v1371_v51 }
 0x708   :  { %v1673_v13 = vpop.eup %1672 }
 0x709   :  { %v812_v16 = vmul.f32 %v1673_v13, %v1671_v11  ;;  %v811_v18 = vmul.f32 %v1673_v13, %v809_v12  ;;  %v1675_v20 = vpop.eup %1674 }
 0x70a   :  { %v802_v21 = vadd.f32 1.0, %v1675_v20 }
 0x70b   :  { %814 = vrot.lane.b32.xlu0 %v812_v16, %s1807_s4  ;;  %v1033_v16 = vld [vmem:[#allocation2 + $0x10] sm:$0x30] }
 0x70c   :  { %1676 = vrcp.f32 %v802_v21  ;;  %v1034_v21 = vld [vmem:[#allocation2 + $0x18] sm:$0x30] }
 0x716   :  { %v1677_v24 = vpop.eup %1676 }
 0x77d   :  { %v815_v22 = vpop.permute.xlu0 %814 }
 0x77e   :  { %v817_v23 = vadd.f32 %v815_v22, %v811_v18 }
 0x780   :  { %1678 = vtanh.f32 %v817_v23  ;;  %v913_v42 = vrot.slane %v817_v23, 6 }
 0x78a   :  { %v1679_v25 = vpop.eup %1678 }
 0x78b   :  { %v819_v26 = vmul.f32 %v1679_v25, %v1677_v24 }
 0x78d   :  { %v823_v27 = vrot.slane %v819_v26, 6 }
 0x78f   :  { %1372 = vmatmul.mubr.msk.f32.vlgmr.msra.gmra.mrb[8].mxu1 %vm301_vm2, %v823_v27 }
 0x790   :  { %1568 = vmatpush1.bf16.msra.mxu1 %v1955_v1  ;;  %1103 = vmatprep.mubr.f32.mxu1 %v1804_v0 }
 0x791   :  { %1570 = vmatprep.subr.bf16.mxu1 %v1957_v2 }
 0x794   :  { %1572 = vmatpush1.bf16.msra.mxu1 %v1975_v7 }
 0x795   :  { %1574 = vmatprep.subr.bf16.mxu1 %v1977_v8 }
 0x798   :  { %1576 = vmatpush1.bf16.msra.mxu1 %v1994_v14 }
 0x799   :  { %1578 = vmatprep.subr.bf16.mxu1 %v1996_v15 }
 0x79c   :  { %1580 = vmatpush1.bf16.msra.mxu1 %v2006_v19 }
 0x862   :  { %v892_v29 = vpop.f32.mrb[8].mxu1 }
 0x863   :  { %v897_v30 = vadd.f32 %v892_v29, %v820_v28  ;;  %v894_v33 = vpop.f32.mrb[9].mxu1 }
 0x864   :  { %v898_v37 = vadd.f32 %v894_v33, %v821_v36 }
 0x865   :  { %v1373_v34 = vmul.f32 -1.442695, %v897_v30 }
 0x866   :  { %v1374_v31 = vmul.f32 -1.442695, %v898_v37 }
 0x867   :  { %1680 = vpow2.f32 %v1373_v34 }
 0x868   :  { %1682 = vtanh.f32 %v898_v37 }
 0x871   :  { %v1681_v38 = vpop.eup %1680 }
 0x872   :  { %v905_v40 = vadd.f32 1.0, %v1681_v38  ;;  %v1683_v41 = vpop.eup %1682 }
 0x874   :  { %1684 = vrcp.f32 %v905_v40 }
 0x875   :  { %1686 = vpow2.f32 %v1374_v31  ;;  %v1143_v31 = vld [vmem:[#allocation2 + $0x10] sm:$0xc0] }
 0x87e   :  { %v1685_v43 = vpop.eup %1684 }
 0x87f   :  { %v916_v32 = vmul.f32 %v1685_v43, %v1683_v41  ;;  %v915_v44 = vmul.f32 %v1685_v43, %v913_v42  ;;  %v1687_v39 = vpop.eup %1686 }
 0x880   :  { %v906_v45 = vadd.f32 1.0, %v1687_v39 }
 0x881   :  { %918 = vrot.lane.b32.xlu1 %v916_v32, %s1807_s4 }
 0x882   :  { %1688 = vrcp.f32 %v906_v45 }
 0x88c   :  { %v1689_v48 = vpop.eup %1688 }
 0x8f3   :  { %v919_v46 = vpop.permute.xlu1 %918 }
 0x8f4   :  { %v921_v47 = vadd.f32 %v919_v46, %v915_v44 }
 0x8f6   :  { %1690 = vtanh.f32 %v921_v47 }
 0x900   :  { %v1691_v49 = vpop.eup %1690 }
 0x901   :  { %v923_v50 = vmul.f32 %v1691_v49, %v1689_v48 }
 0x903   :  { %1375 = vmatmul.mubr.msk.f32.vlgmr.msra.gmra.mrb[8].mxu0 %vm301_vm2, %v923_v50 }
 0x904   :  { %1584 = vmatpush1.bf16.msra.mxu0 %v1955_v1  ;;  %1213 = vmatprep.mubr.f32.mxu0 %v1804_v0  ;;  %v924_v1 = vld [vmem:[#allocation2 + $0x10] sm:$0xc] }
 0x905   :  { %1586 = vmatprep.subr.bf16.mxu0 %v1957_v2 }
 0x908   :  { %1588 = vmatpush1.bf16.msra.mxu0 %v1975_v7 }
 0x909   :  { %1590 = vmatprep.subr.bf16.mxu0 %v1977_v8 }
 0x90c   :  { %1592 = vmatpush1.bf16.msra.mxu0 %v1994_v14 }
 0x90d   :  { %1594 = vmatprep.subr.bf16.mxu0 %v1996_v15  ;;  %v1022_v15 = vrot.slane %v921_v47, 6  ;;  %v1144_v47 = vld [vmem:[#allocation2 + $0x18] sm:$0xc0] }
 0x910   :  { %1596 = vmatpush1.bf16.msra.mxu0 %v2006_v19 }
 0x911   :  { %1597 = vmatprep.subr.bf16.mxu0 %v1805_v17 }
 0x9d6   :  { %v995_v52 = vpop.f32.mrb[8].mxu0 }
 0x9d7   :  { %v1002_v53 = vrot.slane %v995_v52, 6  ;;  %v997_v54 = vpop.f32.mrb[9].mxu0  ;;  %v1253_v52 = vld [vmem:[%s2155_s6] sm:$0xff] }
 0x9d8   :  { %v1003_v2 = vrot.slane %v997_v54, 6  ;;  %v1255_v54 = vld [vmem:[%s2155_s6 + $0x10] sm:$0xff] }
 0x9d9   :  { %v1006_v55 = vadd.f32 %v1002_v53, %v924_v1  ;;  %v1256_v1 = vld [vmem:[%s2155_s6 + $0x18] sm:$0xff] }
 0x9da   :  { %v1007_v7 = vadd.f32 %v1003_v2, %v925_v57  ;;  %v1258_v2 = vld [vmem:[%s2155_s6 + $0x28] sm:$0xff] }
 0x9db   :  { %v1376_v56 = vmul.f32 -1.442695, %v1006_v55  ;;  %v1601_v55 = vpack.c.bf16 %v1256_v1, %v1255_v54 }
 0x9dc   :  { %v1377_v61 = vmul.f32 -1.442695, %v1007_v7 }
 0x9dd   :  { %1692 = vpow2.f32 %v1376_v56  ;;  %v1257_v56 = vld [vmem:[%s2155_s6 + $0x20] sm:$0xff] }
 0x9de   :  { %1694 = vtanh.f32 %v1007_v7  ;;  %v1604_v57 = vpack.c.bf16 %v1258_v2, %v1257_v56 }
 0x9e7   :  { %v1693_v58 = vpop.eup %1692 }
 0x9e8   :  { %v1014_v8 = vadd.f32 1.0, %v1693_v58  ;;  %v1695_v14 = vpop.eup %1694 }
 0x9ea   :  { %1696 = vrcp.f32 %v1014_v8 }
 0x9eb   :  { %1698 = vpow2.f32 %v1377_v61 }
 0x9f4   :  { %v1697_v59 = vpop.eup %1696 }
 0x9f5   :  { %v1025_v19 = vmul.f32 %v1697_v59, %v1695_v14  ;;  %v1024_v60 = vmul.f32 %v1697_v59, %v1022_v15  ;;  %v1699_v62 = vpop.eup %1698  ;;  %v1259_v59 = vld [vmem:[%s2155_s6 + $0x30] sm:$0xff] }
 0x9f6   :  { %v1015_v63 = vadd.f32 1.0, %v1699_v62 }
 0x9f7   :  { %1027 = vrot.lane.b32.xlu0 %v1025_v19, %s1807_s4  ;;  %v1260_v19 = vld [vmem:[%s2155_s6 + $0x38] sm:$0xff] }
 0x9f8   :  { %1700 = vrcp.f32 %v1015_v63 }
 0xa02   :  { %v1701_v5 = vpop.eup %1700 }
 0xa69   :  { %v1028_v3 = vpop.permute.xlu0 %1027 }
 0xa6a   :  { %v1030_v4 = vadd.f32 %v1028_v3, %v1024_v60  ;;  %v1607_v60 = vpack.c.bf16 %v1260_v19, %v1259_v59 }
 0xa6c   :  { %1702 = vtanh.f32 %v1030_v4  ;;  %v1132_v26 = vrot.slane %v1030_v4, 6 }
 0xa76   :  { %v1703_v6 = vpop.eup %1702 }
 0xa77   :  { %v1032_v9 = vmul.f32 %v1703_v6, %v1701_v5 }
 0xa79   :  { %v1036_v10 = vrot.slane %v1032_v9, 2 }
 0xa7b   :  { %1378 = vmatmul.mubr.msk.f32.vlgmr.msra.gmra.mrb[10].mxu1 %vm301_vm2, %v1036_v10  ;;  %v1359_v10 = vld [vmem:[%s2157_s8] ss:$0 sm:$0xff] }
 0xb4e   :  { %v1105_v11 = vpop.f32.mrb[10].mxu1 }
 0xb4f   :  { %v1112_v12 = vrot.slane %v1105_v11, 4  ;;  %v1107_v13 = vpop.f32.mrb[11].mxu1  ;;  %v372_v11 = vadd.f32 %v1359_v10, %v2037_v35 }
 0xb50   :  { %v1113_v20 = vrot.slane %v1107_v13, 4 }
 0xb51   :  { %v1116_v18 = vadd.f32 %v1112_v12, %v1033_v16 }
 0xb52   :  { %v1117_v22 = vadd.f32 %v1113_v20, %v1034_v21 }
 0xb53   :  { %v1379_v51 = vmul.f32 -1.442695, %v1116_v18 }
 0xb54   :  { %v1380_v30 = vmul.f32 -1.442695, %v1117_v22 }
 0xb55   :  { %1704 = vpow2.f32 %v1379_v51 }
 0xb56   :  { %1706 = vtanh.f32 %v1117_v22 }
 0xb5f   :  { %v1705_v23 = vpop.eup %1704 }
 0xb60   :  { %v1124_v24 = vadd.f32 1.0, %v1705_v23  ;;  %v1707_v25 = vpop.eup %1706 }
 0xb62   :  { %1708 = vrcp.f32 %v1124_v24 }
 0xb63   :  { %1710 = vpow2.f32 %v1380_v30 }
 0xb6c   :  { %v1709_v27 = vpop.eup %1708 }
 0xb6d   :  { %v1135_v28 = vmul.f32 %v1709_v27, %v1707_v25  ;;  %v1134_v29 = vmul.f32 %v1709_v27, %v1132_v26  ;;  %v1711_v33 = vpop.eup %1710 }
 0xb6e   :  { %v1125_v34 = vadd.f32 1.0, %v1711_v33 }
 0xb6f   :  { %1137 = vrot.lane.b32.xlu1 %v1135_v28, %s1807_s4 }
 0xb70   :  { %1712 = vrcp.f32 %v1125_v34 }
 0xb7a   :  { %v1713_v38 = vpop.eup %1712 }
 0xbe1   :  { %v1138_v36 = vpop.permute.xlu1 %1137 }
 0xbe2   :  { %v1140_v37 = vadd.f32 %v1138_v36, %v1134_v29 }
 0xbe4   :  { %1714 = vtanh.f32 %v1140_v37  ;;  %v1242_v58 = vrot.slane %v1140_v37, 6 }
 0xbee   :  { %v1715_v40 = vpop.eup %1714 }
 0xbef   :  { %v1142_v41 = vmul.f32 %v1715_v40, %v1713_v38 }
 0xbf1   :  { %v1146_v42 = vrot.slane %v1142_v41, 4 }
 0xbf3   :  { %1381 = vmatmul.mubr.msk.f32.vlgmr.msra.gmra.mrb[10].mxu0 %vm301_vm2, %v1146_v42 }
 0xbf4   :  { %1438 = vmatprep.mubr.msk.f32.mxu0 %vm1806_vm1, %v1804_v0  ;;  %v1254_v0 = vld [vmem:[%s2155_s6 + $0x8] sm:$0xff] }
 0xbf5   :  { %v1598_v53 = vpack.c.bf16 %v1254_v0, %v1253_v52 }
 0xbf7   :  { %1599 = vmatpush3.bf16.msra.mxu0 %v1598_v53 }
 0xbf8   :  { %1600 = vmatprep.subr.bf16.mxu0 %v1805_v17 }
 0xbfb   :  { %1602 = vmatpush3.bf16.msra.mxu0 %v1601_v55 }
 0xbfc   :  { %1603 = vmatprep.subr.bf16.mxu0 %v1805_v17 }
 0xbff   :  { %1605 = vmatpush3.bf16.msra.mxu0 %v1604_v57 }
 0xc00   :  { %1606 = vmatprep.subr.bf16.mxu0 %v1805_v17 }
 0xc03   :  { %1608 = vmatpush3.bf16.msra.mxu0 %v1607_v60 }
 0xcc6   :  { %v1215_v43 = vpop.f32.mrb[10].mxu0 }
 0xcc7   :  { %v1222_v32 = vrot.slane %v1215_v43, 2  ;;  %v1217_v44 = vpop.f32.mrb[11].mxu0 }
 0xcc8   :  { %v1223_v46 = vrot.slane %v1217_v44, 2 }
 0xcc9   :  { %v1226_v39 = vadd.f32 %v1222_v32, %v1143_v31 }
 0xcca   :  { %v1227_v48 = vadd.f32 %v1223_v46, %v1144_v47 }
 0xccb   :  { %v1382_v45 = vmul.f32 -1.442695, %v1226_v39 }
 0xccc   :  { %v1383_v61 = vmul.f32 -1.442695, %v1227_v48 }
 0xccd   :  { %1716 = vpow2.f32 %v1382_v45 }
 0xcce   :  { %1718 = vtanh.f32 %v1227_v48 }
 0xcd7   :  { %v1717_v49 = vpop.eup %1716 }
 0xcd8   :  { %v1234_v50 = vadd.f32 1.0, %v1717_v49  ;;  %v1719_v7 = vpop.eup %1718 }
 0xcda   :  { %1720 = vrcp.f32 %v1234_v50 }
 0xcdb   :  { %1722 = vpow2.f32 %v1383_v61 }
 0xce4   :  { %v1721_v8 = vpop.eup %1720 }
 0xce5   :  { %v1245_v14 = vmul.f32 %v1721_v8, %v1719_v7  ;;  %v1244_v15 = vmul.f32 %v1721_v8, %v1242_v58  ;;  %v1723_v62 = vpop.eup %1722 }
 0xce6   :  { %v1235_v63 = vadd.f32 1.0, %v1723_v62 }
 0xce7   :  { %1247 = vrot.lane.b32.xlu0 %v1245_v14, %s1807_s4  ;;  %s1772_s4 = scalar_lea.vmem %s1345_s10, 32 }
 0xce8   :  { %1724 = vrcp.f32 %v1235_v63  ;;  %p1773_p2 = scmp.ne.s32.totalorder %s1345_s10, %s1772_s4  ;;  %p1778_p4 = scmp.lt.s32.totalorder %s1772_s4, %s1772_s4 }
 0xcea   :  { %p1779_p5 = por %p1778_p4, %p1777_p3 }
 0xcec   :  { %p1780_p6 = pnand %p1779_p5, %p1773_p2 }
 0xcf2   :  { %v1725_v17 = vpop.eup %1724 }
 0xd59   :  { %v1248_v3 = vpop.permute.xlu0 %1247 }
 0xd5a   :  { %v1250_v4 = vadd.f32 %v1248_v3, %v1244_v15 }
 0xd5c   :  { %1726 = vtanh.f32 %v1250_v4 }
 0xd66   :  { %v1727_v5 = vpop.eup %1726 }
 0xd67   :  { %v1252_v6 = vmul.f32 %v1727_v5, %v1725_v17 }
 0xd69   :  { %v1262_v9 = vrot.slane %v1252_v6, 6 }
 0xd6b   :  { %1439 = vmatmul.mubr.msk.f32.vlgmr.msra.gmra.mrb[12].mxu0 %vm301_vm2, %v1262_v9 }
 0xe3e   :  { %v1331_v12 = vpop.f32.mrb[12].mxu0 }
 0xe3f   :  { %v1335_v13 = vadd.f32 %v1331_v12, %v372_v11  ;;  %v1440_v16 = vpop.f32.mrb[13].mxu0 }
 0xe41   :  { %1337 = vst.msk [vmem:[#allocation8] sm:$0x3] %vm1336_vm3, %v1335_v13 }
 0xe42   :  { %1783 = shalt.err (!%p1780_p6)
}
 0xe43   :  { %s1784_s8 = scalar_lea.hbm %s2158_s9, 32 }
 0xe44   :  { %p1785_p7 = scmp.ne.s32.totalorder %s2158_s9, %s1784_s8  ;;  %p1788_p8 = scmp.lt.u32.totalorder %s1784_s8, %s2158_s9 }
 0xe46   :  { %p1790_p9 = pnand %p1788_p8, %p1785_p7 }
 0xe48   :  { %1793 = shalt.err (!%p1790_p9)
}
 0xe49   :  { %1347 = dma.vmem_to_hbm [thread:$0]  %s1345_s10, 32, %s2158_s9, [#allocation5]  }
 0xe4a   :  { %1798 = dma.done.wait [#allocation5], 32  }
 0xe4b   :  { %1799 = vsyncadd [#allocation5], 4294967264 }
 0xe4c   :  { %1351 = vsyncpa [#allocation4], 1 }
 0xe4d   :  { %1352 = vsyncpa [#allocation7], 1 }
 0xe4e   :  { %1353 = vsyncpa [#allocation5], 1 }

</bundles_post_ra>
